<compile_context>
chip_gen: v7x
topology: tpu7x:2x2x1
jax: 0.10.0
libtpu: 0.0.40
codegen_flags: <defaults>
</compile_context>

<pallas_src>
import jax
import jax.numpy as jnp
from jax.experimental import pallas as pl
from jax.experimental.pallas import tpu as pltpu


def _round_up(x, m):
    return (x + m - 1) // m * m


def _pick_n_tile(N, CD, bytes_budget=4 * 1024 * 1024):
    """Token-tile size: full N if it fits the budget, else a multiple of 128
    that divides N (keeps BlockSpec constraints satisfied)."""
    if N * CD * 4 <= bytes_budget:
        return N
    max_tn = max(128, (bytes_budget // (CD * 4)) // 128 * 128)
    for t in range(max_tn, 127, -128):
        if N % t == 0:
            return t
    return N


def _pick_m_tile(M):
    if M <= 512:
        return M
    for t in (512, 256, 128, 64, 32, 16, 8):
        if M % t == 0:
            return t
    return M


def _pool_kernel(m_ref, x_ref, o_ref):
    # m_ref: (1, 1, tn)   x_ref: (1, tn, CD)   o_ref: (1, 1, CD)  (resident acc)
    @pl.when(pl.program_id(1) == 0)
    def _():
        o_ref[...] = jnp.zeros_like(o_ref)

    # MXU reduction over tokens: (1, tn) @ (tn, C*D) -> (1, C*D).
    # Mask rows are pre-normalised, so this IS the masked mean (f32 accumulate).
    o_ref[0] += jnp.dot(m_ref[0], x_ref[0], preferred_element_type=jnp.float32)


def _proj_kernel(p_ref, w_ref, o_ref):
    # p_ref: (tm, D)   w_ref: (D, Kp)   o_ref: (tm, Kp)  (lane-dense, Kp % 128 == 0)
    o_ref[...] = jnp.dot(
        p_ref[...], w_ref[...], preferred_element_type=jnp.float32
    ).astype(o_ref.dtype)


def avg_pool_pallas(x, weight, mask=None, *, gemm_dtype=jnp.float32):
    """
    Masked mean over the token axis N followed by a bias-free Linear.

    Args:
      x:      (B, C, N, D) float32
      weight: (K, D) float32  -- PyTorch nn.Linear layout (dim_out, dim)
      mask:   optional (B, N); nonzero = keep
      gemm_dtype: dtype of the projection-GEMM inputs (f32 accumulation);
                  jnp.bfloat16 recommended on v6e/v7x.
    Returns:
      (B, C, K) float32
    """
    B, C, N, D = x.shape
    K = weight.shape[0]
    CD = C * D
    Kp = _round_up(K, 128)

    # ---- wrapper-side layout plumbing --------------------------------------
    if mask is None:
        m = jnp.full((B, N), 1.0 / N, dtype=jnp.float32)
    else:
        m = mask.astype(jnp.float32)
        m = m / jnp.sum(m, axis=1, keepdims=True)   # rows sum to 1
    m3 = m.reshape(B, 1, N)                         # N lane-dense

    # x as (B, N, C*D): lane dim C*D (>= 128 for realistic C, D).
    x2 = jnp.transpose(x, (0, 2, 1, 3)).reshape(B, N, CD).astype(jnp.float32)

    # Pre-transposed, lane-dense zero-padded weight.
    wt = jnp.zeros((D, Kp), dtype=gemm_dtype).at[:, :K].set(
        weight.T.astype(gemm_dtype))

    # ---- kernel 1: masked mean over N (MXU reduction, N tiled) -------------
    tn = _pick_n_tile(N, CD)
    n_tiles = N // tn if (N % tn == 0) else 1
    if n_tiles == 1:
        tn = N

    vmem_needed = 2 * (tn * CD + tn) * 4 + 2 * CD * 4 + (1 << 20)
    vmem_limit = int(min(64 * 1024 * 1024,
                         max(32 * 1024 * 1024, 2 * vmem_needed)))

    pooled = pl.pallas_call(
        _pool_kernel,
        out_shape=jax.ShapeDtypeStruct((B, 1, CD), jnp.float32),
        grid_spec=pltpu.PrefetchScalarGridSpec(
            num_scalar_prefetch=0,
            grid=(B, n_tiles),
            in_specs=[
                pl.BlockSpec((1, 1, tn), lambda b, n: (b, 0, n)),
                pl.BlockSpec((1, tn, CD), lambda b, n: (b, n, 0)),
            ],
            out_specs=pl.BlockSpec((1, 1, CD), lambda b, n: (b, 0, 0)),
        ),
        compiler_params=pltpu.CompilerParams(
            dimension_semantics=("parallel", "arbitrary"),
            vmem_limit_bytes=vmem_limit,
        ),
    )(m3, x2)

    # ---- kernel 2: batch-fused projection (B*C, D) @ (D, Kp) ---------------
    BC = B * C
    pooled2 = pooled.reshape(BC, D).astype(gemm_dtype)   # free reshape, no transpose
    tm = _pick_m_tile(BC)
    m_tiles = BC // tm if (BC % tm == 0) else 1
    if m_tiles == 1:
        tm = BC

    out_p = pl.pallas_call(
        _proj_kernel,
        out_shape=jax.ShapeDtypeStruct((BC, Kp), jnp.float32),
        grid_spec=pltpu.PrefetchScalarGridSpec(
            num_scalar_prefetch=0,
            grid=(m_tiles,),
            in_specs=[
                pl.BlockSpec((tm, D), lambda i: (i, 0)),
                pl.BlockSpec((D, Kp), lambda i: (0, 0)),   # weight stays resident
            ],
            out_specs=pl.BlockSpec((tm, Kp), lambda i: (i, 0)),
        ),
        compiler_params=pltpu.CompilerParams(
            dimension_semantics=("parallel",),
            vmem_limit_bytes=32 * 1024 * 1024,
        ),
    )(pooled2, wt)

    return out_p.reshape(B, C, Kp)[:, :, :K]


def avg_pool_ref(x, weight, mask=None):
    """Pure-JAX reference matching the PyTorch semantics."""
    B, C, N, D = x.shape
    if mask is not None:
        m = mask.reshape(B, 1, N, 1).astype(x.dtype)
        pooled = (x * m).sum(axis=2) / m.sum(axis=2)
    else:
        pooled = x.mean(axis=2)
    return pooled @ weight.T


if __name__ == "__main__":
    # Small shapes consistent with the module's (B, C, N, D) convention.
    B, C, N, D, K = 2, 4, 8, 32, 16

    key = jax.random.PRNGKey(0)
    kx, kw, km = jax.random.split(key, 3)

    x = jax.random.normal(kx, (B, C, N, D), dtype=jnp.float32)
    bound = 1.0 / (D ** 0.5)
    weight = jax.random.uniform(kw, (K, D), minval=-bound, maxval=bound,
                                dtype=jnp.float32)
    mask = (jax.random.uniform(km, (B, N)) > 0.3).astype(jnp.float32)
    mask = mask.at[:, 0].set(1.0)   # at least one valid token per batch row

    # masked path (f32 GEMM)
    out_masked = avg_pool_pallas(x, weight, mask)
    jax.block_until_ready(out_masked)
    ref_masked = avg_pool_ref(x, weight, mask)

    # mask=None path (plain mean over N)
    out_plain = avg_pool_pallas(x, weight, None)
    jax.block_until_ready(out_plain)
    ref_plain = avg_pool_ref(x, weight, None)

    # bf16 projection-GEMM path (v6e/v7x option); pooling stays f32.
    out_bf16 = avg_pool_pallas(x, weight, mask, gemm_dtype=jnp.bfloat16)
    jax.block_until_ready(out_bf16)

    assert out_masked.shape == (B, C, K)
    assert jnp.allclose(out_masked, ref_masked, atol=1e-4, rtol=1e-4)
    assert jnp.allclose(out_plain, ref_plain, atol=1e-4, rtol=1e-4)
    assert jnp.allclose(out_bf16, ref_masked, atol=5e-2, rtol=5e-2)

    print("KERNEL_OK")
</pallas_src>

<mosaic_0001>
module attributes {stable_mosaic.version = 11 : i64} {
  func.func @_pool_kernel(%arg0: i32, %arg1: i32, %arg2: memref<1x1x8xf32, #tpu.memory_space<vmem>>, %arg3: memref<1x8x128xf32, #tpu.memory_space<vmem>>, %arg4: memref<1x1x128xf32, #tpu.memory_space<vmem>>) attributes {dimension_semantics = [#tpu.dimension_semantics<parallel>, #tpu.dimension_semantics<arbitrary>], iteration_bounds = array<i64: 2, 1>, scalar_prefetch = 0 : i64, scratch_operands = 0 : i64, tpu.core_type = #tpu.core_type<tc>, window_params = [{transform_indices = @transform_0, window_bounds = array<i64: 1, 1, 8>}, {transform_indices = @transform_1, window_bounds = array<i64: 1, 8, 128>}, {transform_indices = @transform_2, window_bounds = array<i64: 1, 1, 128>}]} {
    %c0_i32 = arith.constant 0 : i32
    %0 = arith.cmpi eq, %arg1, %c0_i32 : i32
    %1 = arith.extui %0 : i1 to i32
    %c0_i32_0 = arith.constant 0 : i32
    %2 = arith.cmpi ne, %1, %c0_i32_0 : i32
    scf.if %2 {
      %cst_12 = arith.constant 0.000000e+00 : f32
      %14 = vector.broadcast %cst_12 : f32 to vector<1x1x128xf32>
      %c0_13 = arith.constant 0 : index
      %c0_14 = arith.constant 0 : index
      %c0_15 = arith.constant 0 : index
      %15 = vector.load %arg4[%c0_13, %c0_14, %c0_15] : memref<1x1x128xf32, #tpu.memory_space<vmem>>, vector<1x1x128xf32>
      tpu.vector_store %arg4[%c0_13, %c0_14, %c0_15], %14 {strides = array<i32>} : memref<1x1x128xf32, #tpu.memory_space<vmem>>, vector<1x1x128xf32>,
    } else {
    }
    %c0 = arith.constant 0 : index
    %c0_1 = arith.constant 0 : index
    %c0_2 = arith.constant 0 : index
    %3 = vector.load %arg4[%c0, %c0_1, %c0_2] : memref<1x1x128xf32, #tpu.memory_space<vmem>>, vector<1x1x128xf32>
    %4 = vector.shape_cast %3 : vector<1x1x128xf32> to vector<1x128xf32>
    %c0_3 = arith.constant 0 : index
    %c0_4 = arith.constant 0 : index
    %c0_5 = arith.constant 0 : index
    %5 = vector.load %arg2[%c0_3, %c0_4, %c0_5] : memref<1x1x8xf32, #tpu.memory_space<vmem>>, vector<1x1x8xf32>
    %6 = vector.shape_cast %5 : vector<1x1x8xf32> to vector<1x8xf32>
    %c0_6 = arith.constant 0 : index
    %c0_7 = arith.constant 0 : index
    %c0_8 = arith.constant 0 : index
    %7 = vector.load %arg3[%c0_6, %c0_7, %c0_8] : memref<1x8x128xf32, #tpu.memory_space<vmem>>, vector<1x8x128xf32>
    %8 = vector.shape_cast %7 : vector<1x8x128xf32> to vector<8x128xf32>
    %cst = arith.constant dense<0.000000e+00> : vector<1x128xf32>
    %9 = tpu.matmul %6, %8, %cst {dimension_numbers = #tpu.dot_dimension_numbers<[1], [0], [0], [1], [0, 0, 1, 1], [], []>} : vector<1x8xf32>, vector<8x128xf32>, vector<1x128xf32> -> vector<1x128xf32>
    %10 = arith.addf %4, %9 : vector<1x128xf32>
    %c0_9 = arith.constant 0 : index
    %c0_10 = arith.constant 0 : index
    %c0_11 = arith.constant 0 : index
    %11 = vector.load %arg4[%c0_9, %c0_10, %c0_11] : memref<1x1x128xf32, #tpu.memory_space<vmem>>, vector<1x1x128xf32>
    %12 = vector.shape_cast %11 : vector<1x1x128xf32> to vector<1x128xf32>
    %13 = vector.shape_cast %10 : vector<1x128xf32> to vector<1x1x128xf32>
    tpu.vector_store %arg4[%c0_9, %c0_10, %c0_11], %13 {strides = array<i32>} : memref<1x1x128xf32, #tpu.memory_space<vmem>>, vector<1x1x128xf32>,
    return
  }
  func.func @transform_0(%arg0: i32, %arg1: i32) -> (i32, i32, i32) {
    %c0_i32 = arith.constant 0 : i32
    %c0_i32_0 = arith.constant 0 : i32
    return %arg0, %c0_i32, %arg1 : i32, i32, i32
  }
  func.func @transform_1(%arg0: i32, %arg1: i32) -> (i32, i32, i32) {
    %c0_i32 = arith.constant 0 : i32
    %c0_i32_0 = arith.constant 0 : i32
    return %arg0, %arg1, %c0_i32 : i32, i32, i32
  }
  func.func @transform_2(%arg0: i32, %arg1: i32) -> (i32, i32, i32) {
    %c0_i32 = arith.constant 0 : i32
    %c0_i32_0 = arith.constant 0 : i32
    %c0_i32_1 = arith.constant 0 : i32
    return %arg0, %c0_i32, %c0_i32_0 : i32, i32, i32
  }
}

</mosaic_0001>

<bundles_post_ra>
// kernel: tpu_custom_call.1
= control target key start
LH: loop header
LB: loop body
LE: loop exit
PB: predicated region body
PF: predicated region fallthrough
CT: control target
= control target key end

     0   :  { %7 = vsyncpa [#allocation3], 0  ;;  %s878_s0 = inlined_call_operand.hbm [shape: f32[2,1,8], index: 0, kind: input, shape index: {}]   ;;  %s879_s1 = inlined_call_operand.hbm [shape: f32[2,8,128], index: 1, kind: input, shape index: {}]   ;;  %s880_s2 = inlined_call_operand.hbm [shape: f32[2,1,128], index: 2, kind: output, shape index: {}]  }
   0x1   :  { %9 = vsyncpa [#allocation3 + $0x1], 0 }
   0x2   :  { %10 = vsyncpa [#allocation6], 0 }
   0x3   :  { %12 = vsyncpa [#allocation6 + $0x1], 0 }
   0x4   :  { %13 = vsyncpa [#allocation4], 0 }
   0x5   :  { %15 = vsyncpa [#allocation4 + $0x1], 0  ;;  %s660_s9 = smov 0   ;;  %s662_s10 = smov 0  }
   0x6   :  { %s664_s11 = smov 0   ;;  %s666_s12 = smov 0  }
   0x7   :  { %s668_s13 = smov 0   ;;  %s670_s14 = smov 0  }
   0x8 LB: > { %s403_s15 = sadd.s32 4294967295, %s638_s14   ;;  %s404_s16 = sadd.s32 4294967294, %s638_s14   ;;  %s638_s14 = sphi %s670_s14, %s21_s14   ;;  %s634_s13 = sphi %s668_s13, %s900_s13   ;;  %s630_s12 = sphi %s666_s12, %s899_s12   ;;  %s626_s11 = sphi %s664_s11, %s898_s11   ;;  %s622_s10 = sphi %s662_s10, %s897_s10   ;;  %s618_s9 = sphi %s660_s9, %s896_s9  }
   0x9   : > { %s33_s17 = sadd.s32 1, %s634_s13  ;;  %s42_s18 = sadd.s32 1, %s626_s11 }
   0xa   : > { %p35_p0 = scmp.ge.s32.totalorder %s33_s17, 2  ;;  %p49_p1 = scmp.ne.s32.totalorder %s626_s11, %s622_s10 }
   0xb   : > { %p50_p2 = scmp.eq.s32.totalorder %s638_s14, 0  ;;  %p55_p3 = scmp.ne.s32.totalorder %s622_s10, %s618_s9 }
   0xc   : > { %s902_s17 = smov (%p35_p0, %s33_s17), 0  ;;  %p56_p5 = scmp.eq.s32.totalorder %s403_s15, 0 }
   0xd   : > { %p701_p4 = por %p50_p2, %p49_p1  ;;  %s37_s20 = ssub.s32 %s634_s13, %s902_s17 }
   0xe   : > { %p107_p6 = scmp.eq.s32.totalorder %s403_s15, 1  ;;  %p40_p7 = scmp.eq.s32.totalorder %s37_s20, 0 }
   0xf   : > { %p707_p8 = por %p56_p5, %p55_p3  ;;  %p113_p10 = scmp.eq.s32.totalorder %s404_s16, 1 }
  0x10   : > { %p711_p9 = por %p107_p6, %p49_p1  ;;  %p440_p13 = scmp.lt.s32.totalorder %s638_s14, 2 }
  0x11   : > { %s884_s21 = scalar_select %p707_p8, 1, 0 }
  0x12   : > { %s885_s22 = scalar_select %p711_p9, 1, 0 }
  0x13   : > { %s716_s23 = scalar_select %p40_p7, %s626_s11, %s42_s18  }
  0x14   : > { %p718_p11 = por %p113_p10, %p55_p3  ;;  %s725_s25 = sand.u32 1, %s626_s11  }
  0x15   : > { %s407_s26 = sshll.u32 %s634_s13, 4  ;;  %s136_s27 = scalar_lea.vmem [#allocation2], %s725_s25 }
  0x16   : > { %s886_s24 = scalar_select %p718_p11, 1, 0 }
  0x17   : > { %s144_s28 = sshll.u32 %s136_s27, 4  ;;  %s732_s3 = scalar_lea.hbm %s878_s0, %s407_s26  ;;  %s734_s28 = int_to_ptr.vmem [resolvable:$true] %s144_s28 }
  0x18   : > { %p738_p0 = pnand %p440_p13, %p701_p4  ;;  %s408_s5 = sshll.u32 %s725_s25, 3 }
  0x19   : > { %s134_s6 = scalar_lea.sflag [#allocation3], %s725_s25  ;;  %s492_s7 = scalar_lea.hbm %s732_s3, 16 }
  0x1a   : > { %p493_p3 = scmp.ne.s32.totalorder %s732_s3, %s492_s7  ;;  %p494_p5 = pneg %p738_p0 }
  0x1b   : > { %s497_s16 = scalar_lea.hbm %s878_s0, 32  ;;  %p498_p4 = scmp.lt.u32.totalorder %s732_s3, %s878_s0 }
  0x1c   : > { %p495_p6 = pnand %p494_p5, %p493_p3  ;;  %p499_p10 = scmp.lt.u32.totalorder %s497_s16, %s492_s7 }
  0x1d   : > { %p501_p12 = scmp.lt.u32.totalorder %s492_s7, %s732_s3 }
  0x1e   : > { %p496_p7 = pneg %p495_p6  ;;  %p500_p13 = por %p499_p10, %p498_p4 }
  0x20   : > { %p502_p1 = por %p501_p12, %p500_p13 }
  0x22   : > { %p503_p2 = pnand %p502_p1, %p496_p7 }
  0x24   : > { %506 = shalt.err (!%p503_p2)
}
  0x25   : > { %s507_s20 = scalar_lea.vmem %s734_s28, 16  ;;  %s640_s26 = smov [#allocation2]  }
  0x26   : > { %p508_p3 = scmp.ne.s32.totalorder %s734_s28, %s507_s20  ;;  %s512_s27 = sshll.u32 %s640_s26, 4  ;;  %s513_s27 = int_to_ptr.vmem [resolvable:$false] %s512_s27 }
  0x27   : > { %s514_s29 = scalar_lea.vmem %s513_s27, 32  ;;  %p515_p9 = scmp.lt.s32.totalorder %s734_s28, %s513_s27 }
  0x28   : > { %p510_p6 = pnand %p508_p3, %p494_p5  ;;  %p516_p4 = scmp.lt.s32.totalorder %s514_s29, %s507_s20 }
  0x2a   : > { %p511_p11 = pneg %p510_p6  ;;  %p517_p10 = por %p516_p4, %p515_p9 }
  0x2c   : > { %p518_p12 = pnand %p517_p10, %p511_p11 }
  0x2e   : > { %521 = shalt.err (!%p518_p12)
}
  0x2f   : > { %432 = dma.hbm_to_vmem [thread:$0]  (!%p738_p0), %s732_s3, 16, %s734_s28, %s134_s6  }
  0x30   : > { %p888_p1 = scmp.lt.s32.totalorder %s638_s14, 3  ;;  %p889_p2 = scmp.ge.s32.totalorder %s638_s14, 1 }
  0x31   : > { %s409_s7 = sshll.u32 %s634_s13, 7  ;;  %s155_s8 = scalar_lea.vmem [#allocation5], %s408_s5 }
  0x32   : > { %p775_p7 = pnand %p889_p2, %p888_p1  ;;  %s163_s15 = sshll.u32 %s155_s8, 4  ;;  %s164_s15 = int_to_ptr.vmem [resolvable:$true] %s163_s15 }
  0x33   : > { %s785_s19 = scalar_lea.hbm %s879_s1, %s409_s7  ;;  %s152_s28 = scalar_lea.sflag [#allocation6], %s725_s25 }
  0x34   : > { %s890_s30 = scalar_select %p775_p7, 1, 0 }
  0x35   : > { %s522_s3 = scalar_lea.hbm %s785_s19, 128  ;;  %s527_s20 = scalar_lea.hbm %s879_s1, 256 }
  0x36   : > { %p523_p9 = scmp.ne.s32.totalorder %s785_s19, %s522_s3  ;;  %p528_p3 = scmp.lt.u32.totalorder %s785_s19, %s879_s1 }
  0x37   : > { %p529_p6 = scmp.lt.u32.totalorder %s527_s20, %s522_s3  ;;  %p531_p10 = scmp.lt.u32.totalorder %s522_s3, %s785_s19 }
  0x38   : > { %p525_p11 = pnand %p523_p9, %p494_p5 }
  0x39   : > { %p530_p4 = por %p529_p6, %p528_p3 }
  0x3a   : > { %p526_p13 = pneg %p525_p11 }
  0x3b   : > { %p532_p12 = por %p531_p10, %p530_p4 }
  0x3d   : > { %p533_p1 = pnand %p532_p12, %p526_p13 }
  0x3f   : > { %536 = shalt.err (!%p533_p1)
}
  0x40   : > { %s537_s25 = scalar_lea.vmem %s164_s15, 128  ;;  %s641_s29 = smov [#allocation5]  }
  0x41   : > { %p538_p2 = scmp.ne.s32.totalorder %s164_s15, %s537_s25  ;;  %s542_s7 = sshll.u32 %s641_s29, 4  ;;  %s543_s7 = int_to_ptr.vmem [resolvable:$false] %s542_s7 }
  0x42   : > { %s544_s8 = scalar_lea.vmem %s543_s7, 256  ;;  %p545_p8 = scmp.lt.s32.totalorder %s164_s15, %s543_s7 }
  0x43   : > { %p540_p9 = pnand %p538_p2, %p494_p5  ;;  %p546_p7 = scmp.lt.s32.totalorder %s544_s8, %s537_s25 }
  0x45   : > { %p541_p11 = pneg %p540_p9  ;;  %p547_p3 = por %p546_p7, %p545_p8 }
  0x47   : > { %p548_p6 = pnand %p547_p3, %p541_p11 }
  0x49   : > { %551 = shalt.err (!%p548_p6)
}
  0x4a   : > { %435 = dma.hbm_to_vmem [thread:$0]  (!%p738_p0), %s785_s19, 128, %s164_s15, %s152_s28  }
  0x4b   : > { %p891_p13 = scmp.ne.s32.totalorder %s890_s30, 0 }
  0x4c   : > { %s810_s16 = sand.u32 (!%p891_p13), 1, %s622_s10   ;;  %p892_p5 = scmp.ne.s32.totalorder (!%p891_p13), %s884_s21, 0 }
  0x4d   : > { %172 = sbr.rel (%p891_p13) target bundleno = 319 (0x13f), region = 28  ;;  %s175_s18 = scalar_lea.sflag (!%p891_p13), [#allocation3], %s810_s16 }
  0x4e   : > { %s177_s3 = scalar_lea.vmem (!%p891_p13), [#allocation2], %s810_s16 }
  0x54   : > { %605 = dma.done.wait (%p892_p5), %s175_s18, 16  }
  0x55   : > { %607 = vsyncadd (%p892_p5), %s175_s18, 4294967280  ;;  %s411_s4 = sshll.u32 %s810_s16, 3  ;;  %s183_s15 = scalar_lea.sflag [#allocation6], %s810_s16 }
  0x56   : > { %s186_s30 = scalar_lea.vmem [#allocation5], %s411_s4 }
  0x57   : > { %609 = dma.done.wait (%p892_p5), %s183_s15, 128  }
  0x58   : > { %611 = vsyncadd (%p892_p5), %s183_s15, 4294967168  ;;  %s209_s19 = scalar_lea.vmem [#allocation7], %s810_s16  ;;  %v642_v0 = vmov 0.0   ;;  %vm643_vm0 = vmmov 0   ;;  %vm218_vm1 = vcmask 64512   ;;  %v217_v1 = vld [vmem:[%s186_s30] sm:$0xff] }
  0x59   : > { %214 = vst [vmem:[%s209_s19] sm:$0x1] %v642_v0  ;;  %418 = vmatprep.subr.mxu0 %v642_v0  ;;  %420 = vmatprep.mubr.msk.f32.mxu0 %vm643_vm0, %v642_v0  ;;  %v216_v2 = vld [vmem:[%s177_s3] sm:$0x1]  ;;  %s413_s28 = sshll.u32 %s630_s12, 4  ;;  %s307_s6 = sshll.u32 %s209_s19, 4  ;;  %s831_s6 = int_to_ptr.vmem [resolvable:$true] %s307_s6 }
  0x5a   : > { %419 = vmatpush3.msra.mxu0 %v217_v1  ;;  %s829_s20 = scalar_lea.hbm %s880_s2, %s413_s28  ;;  %s295_s26 = scalar_lea.sflag [#allocation4], %s810_s16 }
  0x5b   : > { %421 = vmatmul.mubr.msk.f32.vlgmr.msra.gmra.mrb[0].mxu0 %vm218_vm1, %v216_v2  ;;  %s552_s27 = scalar_lea.vmem %s831_s6, 16  ;;  %p893_p0 = scmp.ne.s32.totalorder %s885_s22, 0 }
  0x5c   : > { %p553_p8 = scmp.ne.s32.totalorder %s831_s6, %s552_s27  ;;  %s644_s12 = smov [#allocation7]  }
  0x5d   : > { %s556_s25 = sshll.u32 %s644_s12, 4  ;;  %s557_s25 = int_to_ptr.vmem [resolvable:$false] %s556_s25 }
  0x5e   : > { %p554_p7 = pnand %p553_p8, %p893_p0  ;;  %s558_s29 = scalar_lea.vmem %s557_s25, 32 }
  0x5f   : > { %p559_p10 = scmp.lt.s32.totalorder %s831_s6, %s557_s25  ;;  %p560_p12 = scmp.lt.s32.totalorder %s558_s29, %s552_s27 }
  0x60   : > { %v215_v3 = vld [vmem:[%s209_s19] sm:$0x1]  ;;  %p555_p4 = pneg %p554_p7 }
  0x61   : > { %p561_p1 = por %p560_p12, %p559_p10 }
  0x63   : > { %p562_p2 = pnand %p561_p1, %p555_p4 }
 0x12e   : > { %v288_v4 = vpop.f32.mrb[0].mxu0 }
 0x12f   : > { %v292_v5 = vadd.f32 %v288_v4, %v215_v3  ;;  %v422_v6 = vpop.f32.mrb[1].mxu0 }
 0x131   : > { %293 = vst [vmem:[%s209_s19] sm:$0x1] %v292_v5 }
 0x132   : > { %565 = shalt.err (!%p562_p2)
}
 0x133   : > { %s566_s7 = scalar_lea.hbm %s829_s20, 16  ;;  %s570_s18 = scalar_lea.hbm %s880_s2, 32 }
 0x134   : > { %p567_p9 = scmp.ne.s32.totalorder %s829_s20, %s566_s7  ;;  %p571_p6 = scmp.lt.u32.totalorder %s829_s20, %s880_s2 }
 0x135   : > { %p572_p13 = scmp.lt.u32.totalorder %s570_s18, %s566_s7  ;;  %p574_p8 = scmp.lt.u32.totalorder %s566_s7, %s829_s20 }
 0x136   : > { %p568_p11 = pnand %p567_p9, %p893_p0 }
 0x137   : > { %p573_p5 = por %p572_p13, %p571_p6 }
 0x138   : > { %p569_p3 = pneg %p568_p11 }
 0x139   : > { %p575_p7 = por %p574_p8, %p573_p5 }
 0x13b   : > { %p576_p4 = pnand %p575_p7, %p569_p3 }
 0x13d   : > { %579 = shalt.err (!%p576_p4)
}
 0x13e   : > { %427 = dma.vmem_to_hbm [thread:$0]  (%p893_p0), %s831_s6, 16, %s829_s20, %s295_s26  }
 0x13f PF: > { %s319_s15 = sand.u32 1, %s618_s9   ;;  %p894_p10 = scmp.ne.s32.totalorder %s886_s24, 0 }
 0x140   : > { %p895_p12 = scmp.ge.s32.totalorder %s638_s14, 2  ;;  %s320_s30 = scalar_lea.sflag [#allocation4], %s319_s15 }
 0x142   : > { %p437_p1 = pnand %p895_p12, %p894_p10 }
 0x144   : > { %613 = dma.done.wait (!%p437_p1), %s320_s30, 16  }
 0x145   : > { %615 = vsyncadd (!%p437_p1), %s320_s30, 4294967280  ;;  %s21_s14 = sadd.s32 1, %s638_s14   ;;  %s896_s9 = smov %s622_s10 }
 0x146   : > { %p18_p2 = scmp.ge.s32.totalorder %s21_s14, 4   ;;  %s897_s10 = smov %s626_s11 }
 0x147   : > { %s898_s11 = smov %s716_s23  ;;  %s899_s12 = smov %s634_s13 }
 0x148   : > { %s900_s13 = smov %s902_s17  ;;  %20 = sbr.rel (!%p18_p2) target bundleno = 8 (0x8), region = 90 }
 0x14f   :  { %324 = vsyncpa [#allocation3], 1 }
 0x150   :  { %326 = vsyncpa [#allocation3 + $0x1], 1 }
 0x151   :  { %327 = vsyncpa [#allocation6], 1 }
 0x152   :  { %329 = vsyncpa [#allocation6 + $0x1], 1 }
 0x153   :  { %330 = vsyncpa [#allocation4], 1 }
 0x154   :  { %332 = vsyncpa [#allocation4 + $0x1], 1 }

</bundles_post_ra>
